<compile_context>
chip_gen: v7x
topology: tpu7x:2x2x1
jax: 0.10.0
libtpu: 0.0.40
codegen_flags: <defaults>
</compile_context>

<pallas_src>
import functools

import jax
import jax.numpy as jnp
from jax.experimental import pallas as pl
from jax.experimental.pallas import tpu as pltpu  # noqa: F401  (TPU backend)


def _round_up(n, m):
    return (n + m - 1) // m * m


def _fused_kernel(x_ref, z_ref, w_ref, o_ref, *, feat_dim):
    """Fused forward of the three MLP-softmax branches.

    x_ref : (B, F)      input x
    z_ref : (B, F)      input z
    w_ref : (3F+8, W)   packed weight slab (see prepare_params for layout)
    o_ref : (B, 128)    packed output: cols 0-1=y1, 2-3=y2, 4-5=s
    """
    F = feat_dim
    x = x_ref[...]
    z = z_ref[...]

    # Static row offsets inside the packed slab.
    r_ys_b1 = F
    r_y1_w2 = F + 1
    r_s_w2 = F + 3
    r_y2_w1 = F + 5
    r_y2_b1 = 3 * F + 5
    r_y2_w2 = 3 * F + 6

    def layer1(cols, w1_row0, n_k, b1_row):
        # Outer-product accumulate on the VPU (contraction dim is 1-2, so no
        # zero-padded MXU matmul). Bias row carries 1.0 "bias-fold" lanes.
        acc = cols[0] * w_ref[w1_row0:w1_row0 + 1, :]
        for k in range(1, n_k):
            acc = acc + cols[k] * w_ref[w1_row0 + k:w1_row0 + k + 1, :]
        return jnp.maximum(acc + w_ref[b1_row:b1_row + 1, :], 0.0)   # (B, W)

    def logit(h, row):
        # One XLU lane reduction per class; layer-2 bias is folded into the
        # weight row at the bias-fold lane (where h == 1.0).
        return jnp.sum(h * w_ref[row:row + 1, :], axis=-1, keepdims=True)

    def softmax2(l0, l1):
        # out_dim == 2: softmax == sigmoid of the logit difference.
        e = jnp.exp(l1 - l0)
        p0 = pl.reciprocal(1.0 + e, approx=False)
        return p0, 1.0 - p0

    x_cols = [x[:, k:k + 1] for k in range(F)]
    z_cols = [z[:, k:k + 1] for k in range(F)]

    # Fused y1 | s branch (same input x, hidden vectors packed side by side
    # in disjoint lane ranges of the same vregs).
    h_ys = layer1(x_cols, 0, F, r_ys_b1)
    p_y1_0, p_y1_1 = softmax2(logit(h_ys, r_y1_w2), logit(h_ys, r_y1_w2 + 1))
    p_s_0, p_s_1 = softmax2(logit(h_ys, r_s_w2), logit(h_ys, r_s_w2 + 1))

    # y2 branch: input = concat(x, z) -> columns 0..F-1 from x, F..2F-1 from z.
    h_y2 = layer1(x_cols + z_cols, r_y2_w1, 2 * F, r_y2_b1)
    p_y2_0, p_y2_1 = softmax2(logit(h_y2, r_y2_w2), logit(h_y2, r_y2_w2 + 1))

    # Assemble one lane-dense (B, 128) result in registers and do a single
    # unmasked full-ref store (no masked vst.msk column writes).
    lane = jax.lax.broadcasted_iota(jnp.int32, o_ref.shape, 1)
    out = jnp.where(lane == 0, p_y1_0,
          jnp.where(lane == 1, p_y1_1,
          jnp.where(lane == 2, p_y2_0,
          jnp.where(lane == 3, p_y2_1,
          jnp.where(lane == 4, p_s_0,
          jnp.where(lane == 5, p_s_1, 0.0))))))
    o_ref[...] = out.astype(o_ref.dtype)


def forward(pp, x, z):
    """Fused forward of the three MLP-softmax branches. Returns (y1, y2, s)."""
    B, F = x.shape
    slab = pp["slab"]

    out = pl.pallas_call(
        functools.partial(_fused_kernel, feat_dim=F),
        out_shape=jax.ShapeDtypeStruct((B, 128), jnp.float32),
        in_specs=[pl.BlockSpec(x.shape, lambda: (0, 0)),
                  pl.BlockSpec(z.shape, lambda: (0, 0)),
                  pl.BlockSpec(slab.shape, lambda: (0, 0))],
        out_specs=pl.BlockSpec((B, 128), lambda: (0, 0)),
    )(x, z, slab)

    return out[:, 0:2], out[:, 2:4], out[:, 4:6]


def init_params(key, feat_dim=1, out_dim=2, hidden_dim=1000):
    """Deterministic torch.nn.Linear-style init. Weights stored (in, out)."""
    def linear(k, fan_in, fan_out):
        bound = 1.0 / (fan_in ** 0.5)
        kw, kb = jax.random.split(k)
        w = jax.random.uniform(kw, (fan_in, fan_out), jnp.float32, -bound, bound)
        b = jax.random.uniform(kb, (fan_out,), jnp.float32, -bound, bound)
        return w, b

    ks = jax.random.split(key, 5)
    p = {}
    p["y1_in_w"], p["y1_in_b"] = linear(ks[0], feat_dim, hidden_dim)
    p["y1_out_w"], p["y1_out_b"] = linear(ks[1], hidden_dim, out_dim)
    p["y2_in_w"], p["y2_in_b"] = linear(ks[2], 2 * feat_dim, 2 * hidden_dim)
    p["y2_out_w"], p["y2_out_b"] = linear(ks[3], 2 * hidden_dim, out_dim)
    # NOTE: in the PyTorch module the first `s_in` assignment is overwritten,
    # so only Linear(feat_dim, hidden_dim) survives.
    ks2 = jax.random.split(ks[4], 2)
    p["s_in_w"], p["s_in_b"] = linear(ks2[0], feat_dim, hidden_dim)
    p["s_out_w"], p["s_out_b"] = linear(ks2[1], hidden_dim, 2)
    return p


def prepare_params(raw, feat_dim, hidden_dim):
    """One-time packing of all weights/biases into a single (3F+8, W) slab.

    Row layout (F = feat_dim, Hp/H2p = lane-padded hidden sizes, W = 2*Hp):
      rows [0, F)        : fused y1|s layer-1 weights (y1 in lanes [0,Hp),
                           s in lanes [Hp, 2Hp))
      row  F             : fused y1|s layer-1 bias, with 1.0 "bias-fold" lanes
                           at Hp-1 and 2Hp-1
      rows F+1, F+2      : y1 layer-2 weight rows (class 0/1), b2 folded at Hp-1
      rows F+3, F+4      : s  layer-2 weight rows (class 0/1), b2 folded at 2Hp-1
      rows [F+5, 3F+5)   : y2 layer-1 weights (lanes [0, 2H))
      row  3F+5          : y2 layer-1 bias, 1.0 bias-fold lane at H2p-1
      rows 3F+6, 3F+7    : y2 layer-2 weight rows (class 0/1), b2 folded at H2p-1
    """
    assert raw["y1_out_w"].shape[1] == 2, "only out_dim == 2 is supported"
    F = feat_dim
    H = hidden_dim
    H2 = 2 * H
    Hp = _round_up(H + 1, 128)      # +1 guarantees a spare bias-fold lane
    H2p = _round_up(H2 + 1, 128)
    W = max(2 * Hp, H2p)

    slab = jnp.zeros((3 * F + 8, W), jnp.float32)

    # fused y1|s layer-1 weights
    slab = slab.at[0:F, 0:H].set(raw["y1_in_w"])
    slab = slab.at[0:F, Hp:Hp + H].set(raw["s_in_w"])
    # fused y1|s layer-1 bias (+ bias-fold lanes)
    slab = slab.at[F, 0:H].set(raw["y1_in_b"])
    slab = slab.at[F, Hp - 1].set(1.0)
    slab = slab.at[F, Hp:Hp + H].set(raw["s_in_b"])
    slab = slab.at[F, 2 * Hp - 1].set(1.0)
    # y1 / s layer-2 weight rows with b2 folded into the bias-fold lane
    for j in range(2):
        slab = slab.at[F + 1 + j, 0:H].set(raw["y1_out_w"][:, j])
        slab = slab.at[F + 1 + j, Hp - 1].set(raw["y1_out_b"][j])
        slab = slab.at[F + 3 + j, Hp:Hp + H].set(raw["s_out_w"][:, j])
        slab = slab.at[F + 3 + j, 2 * Hp - 1].set(raw["s_out_b"][j])
    # y2 layer-1 weights / bias
    slab = slab.at[F + 5:3 * F + 5, 0:H2].set(raw["y2_in_w"])
    slab = slab.at[3 * F + 5, 0:H2].set(raw["y2_in_b"])
    slab = slab.at[3 * F + 5, H2p - 1].set(1.0)
    # y2 layer-2 weight rows with b2 folded
    for j in range(2):
        slab = slab.at[3 * F + 6 + j, 0:H2].set(raw["y2_out_w"][:, j])
        slab = slab.at[3 * F + 6 + j, H2p - 1].set(raw["y2_out_b"][j])

    return {"slab": slab}


def _reference_branch(x, w1, b1, w2, b2):
    h = jnp.maximum(x @ w1 + b1, 0.0)
    logits = h @ w2 + b2
    return jax.nn.softmax(logits, axis=1)


if __name__ == "__main__":
    feat_dim, out_dim, hidden_dim = 1, 2, 1000
    batch = 8

    key = jax.random.PRNGKey(0)
    kp, kx, kz = jax.random.split(key, 3)
    raw = init_params(kp, feat_dim, out_dim, hidden_dim)
    params = prepare_params(raw, feat_dim, hidden_dim)
    x = jax.random.normal(kx, (batch, feat_dim), jnp.float32)
    z = jax.random.normal(kz, (batch, feat_dim), jnp.float32)

    y1, y2, s = forward(params, x, z)
    jax.block_until_ready((y1, y2, s))

    # Sanity check against a pure-JAX reference of the same math.
    ref_y1 = _reference_branch(x, raw["y1_in_w"], raw["y1_in_b"],
                               raw["y1_out_w"], raw["y1_out_b"])
    ref_y2 = _reference_branch(jnp.concatenate((x, z), axis=1),
                               raw["y2_in_w"], raw["y2_in_b"],
                               raw["y2_out_w"], raw["y2_out_b"])
    ref_s = _reference_branch(x, raw["s_in_w"], raw["s_in_b"],
                              raw["s_out_w"], raw["s_out_b"])
    assert y1.shape == (batch, out_dim)
    assert y2.shape == (batch, out_dim)
    assert s.shape == (batch, 2)
    assert jnp.allclose(y1, ref_y1, atol=1e-5)
    assert jnp.allclose(y2, ref_y2, atol=1e-5)
    assert jnp.allclose(s, ref_s, atol=1e-5)

    print("KERNEL_OK")
</pallas_src>

<mosaic_0001>
module attributes {stable_mosaic.version = 11 : i64} {
  func.func @_fused_kernel(%arg0: memref<8x1xf32, #tpu.memory_space<vmem>>, %arg1: memref<8x1xf32, #tpu.memory_space<vmem>>, %arg2: memref<11x2048xf32, #tpu.memory_space<vmem>>, %arg3: memref<8x128xf32, #tpu.memory_space<vmem>>) attributes {dimension_semantics = [], scalar_prefetch = 0 : i64, scratch_operands = 0 : i64, tpu.core_type = #tpu.core_type<tc>} {
    %c0 = arith.constant 0 : index
    %c0_0 = arith.constant 0 : index
    %0 = vector.load %arg0[%c0, %c0_0] : memref<8x1xf32, #tpu.memory_space<vmem>>, vector<8x1xf32>
    %c0_1 = arith.constant 0 : index
    %c0_2 = arith.constant 0 : index
    %1 = vector.load %arg1[%c0_1, %c0_2] : memref<8x1xf32, #tpu.memory_space<vmem>>, vector<8x1xf32>
    %c0_3 = arith.constant 0 : index
    %c0_4 = arith.constant 0 : index
    %2 = vector.load %arg2[%c0_3, %c0_4] : memref<11x2048xf32, #tpu.memory_space<vmem>>, vector<1x2048xf32>
    %3 = vector.broadcast %0 : vector<8x1xf32> to vector<8x2048xf32>
    %4 = vector.broadcast %2 : vector<1x2048xf32> to vector<8x2048xf32>
    %5 = arith.mulf %3, %4 : vector<8x2048xf32>
    %c1 = arith.constant 1 : index
    %c0_5 = arith.constant 0 : index
    %6 = vector.load %arg2[%c1, %c0_5] : memref<11x2048xf32, #tpu.memory_space<vmem>>, vector<1x2048xf32>
    %7 = vector.broadcast %6 : vector<1x2048xf32> to vector<8x2048xf32>
    %8 = arith.addf %5, %7 : vector<8x2048xf32>
    %cst = arith.constant 0.000000e+00 : f32
    %9 = vector.broadcast %cst : f32 to vector<8x2048xf32>
    %10 = arith.maximumf %8, %9 : vector<8x2048xf32>
    %c2 = arith.constant 2 : index
    %c0_6 = arith.constant 0 : index
    %11 = vector.load %arg2[%c2, %c0_6] : memref<11x2048xf32, #tpu.memory_space<vmem>>, vector<1x2048xf32>
    %12 = vector.broadcast %11 : vector<1x2048xf32> to vector<8x2048xf32>
    %13 = arith.mulf %10, %12 : vector<8x2048xf32>
    %cst_7 = arith.constant dense<0.000000e+00> : vector<8xf32>
    %14 = vector.multi_reduction <add>, %13, %cst_7 [1] : vector<8x2048xf32> to vector<8xf32>
    %15 = vector.shape_cast %14 : vector<8xf32> to vector<8x1xf32>
    %c3 = arith.constant 3 : index
    %c0_8 = arith.constant 0 : index
    %16 = vector.load %arg2[%c3, %c0_8] : memref<11x2048xf32, #tpu.memory_space<vmem>>, vector<1x2048xf32>
    %17 = vector.broadcast %16 : vector<1x2048xf32> to vector<8x2048xf32>
    %18 = arith.mulf %10, %17 : vector<8x2048xf32>
    %cst_9 = arith.constant dense<0.000000e+00> : vector<8xf32>
    %19 = vector.multi_reduction <add>, %18, %cst_9 [1] : vector<8x2048xf32> to vector<8xf32>
    %20 = vector.shape_cast %19 : vector<8xf32> to vector<8x1xf32>
    %21 = arith.subf %20, %15 : vector<8x1xf32>
    %22 = math.exp %21 : vector<8x1xf32>
    %cst_10 = arith.constant 1.000000e+00 : f32
    %23 = vector.broadcast %cst_10 : f32 to vector<8x1xf32>
    %24 = arith.addf %23, %22 : vector<8x1xf32>
    %25 = tpu.reciprocal %24 : vector<8x1xf32> -> vector<8x1xf32>
    %cst_11 = arith.constant 1.000000e+00 : f32
    %26 = vector.broadcast %cst_11 : f32 to vector<8x1xf32>
    %27 = arith.subf %26, %25 : vector<8x1xf32>
    %c4 = arith.constant 4 : index
    %c0_12 = arith.constant 0 : index
    %28 = vector.load %arg2[%c4, %c0_12] : memref<11x2048xf32, #tpu.memory_space<vmem>>, vector<1x2048xf32>
    %29 = vector.broadcast %28 : vector<1x2048xf32> to vector<8x2048xf32>
    %30 = arith.mulf %10, %29 : vector<8x2048xf32>
    %cst_13 = arith.constant dense<0.000000e+00> : vector<8xf32>
    %31 = vector.multi_reduction <add>, %30, %cst_13 [1] : vector<8x2048xf32> to vector<8xf32>
    %32 = vector.shape_cast %31 : vector<8xf32> to vector<8x1xf32>
    %c5 = arith.constant 5 : index
    %c0_14 = arith.constant 0 : index
    %33 = vector.load %arg2[%c5, %c0_14] : memref<11x2048xf32, #tpu.memory_space<vmem>>, vector<1x2048xf32>
    %34 = vector.broadcast %33 : vector<1x2048xf32> to vector<8x2048xf32>
    %35 = arith.mulf %10, %34 : vector<8x2048xf32>
    %cst_15 = arith.constant dense<0.000000e+00> : vector<8xf32>
    %36 = vector.multi_reduction <add>, %35, %cst_15 [1] : vector<8x2048xf32> to vector<8xf32>
    %37 = vector.shape_cast %36 : vector<8xf32> to vector<8x1xf32>
    %38 = arith.subf %37, %32 : vector<8x1xf32>
    %39 = math.exp %38 : vector<8x1xf32>
    %cst_16 = arith.constant 1.000000e+00 : f32
    %40 = vector.broadcast %cst_16 : f32 to vector<8x1xf32>
    %41 = arith.addf %40, %39 : vector<8x1xf32>
    %42 = tpu.reciprocal %41 : vector<8x1xf32> -> vector<8x1xf32>
    %cst_17 = arith.constant 1.000000e+00 : f32
    %43 = vector.broadcast %cst_17 : f32 to vector<8x1xf32>
    %44 = arith.subf %43, %42 : vector<8x1xf32>
    %c6 = arith.constant 6 : index
    %c0_18 = arith.constant 0 : index
    %45 = vector.load %arg2[%c6, %c0_18] : memref<11x2048xf32, #tpu.memory_space<vmem>>, vector<1x2048xf32>
    %46 = vector.broadcast %0 : vector<8x1xf32> to vector<8x2048xf32>
    %47 = vector.broadcast %45 : vector<1x2048xf32> to vector<8x2048xf32>
    %48 = arith.mulf %46, %47 : vector<8x2048xf32>
    %c7 = arith.constant 7 : index
    %c0_19 = arith.constant 0 : index
    %49 = vector.load %arg2[%c7, %c0_19] : memref<11x2048xf32, #tpu.memory_space<vmem>>, vector<1x2048xf32>
    %50 = vector.broadcast %1 : vector<8x1xf32> to vector<8x2048xf32>
    %51 = vector.broadcast %49 : vector<1x2048xf32> to vector<8x2048xf32>
    %52 = arith.mulf %50, %51 : vector<8x2048xf32>
    %53 = arith.addf %48, %52 : vector<8x2048xf32>
    %c8 = arith.constant 8 : index
    %c0_20 = arith.constant 0 : index
    %54 = vector.load %arg2[%c8, %c0_20] : memref<11x2048xf32, #tpu.memory_space<vmem>>, vector<1x2048xf32>
    %55 = vector.broadcast %54 : vector<1x2048xf32> to vector<8x2048xf32>
    %56 = arith.addf %53, %55 : vector<8x2048xf32>
    %cst_21 = arith.constant 0.000000e+00 : f32
    %57 = vector.broadcast %cst_21 : f32 to vector<8x2048xf32>
    %58 = arith.maximumf %56, %57 : vector<8x2048xf32>
    %c9 = arith.constant 9 : index
    %c0_22 = arith.constant 0 : index
    %59 = vector.load %arg2[%c9, %c0_22] : memref<11x2048xf32, #tpu.memory_space<vmem>>, vector<1x2048xf32>
    %60 = vector.broadcast %59 : vector<1x2048xf32> to vector<8x2048xf32>
    %61 = arith.mulf %58, %60 : vector<8x2048xf32>
    %cst_23 = arith.constant dense<0.000000e+00> : vector<8xf32>
    %62 = vector.multi_reduction <add>, %61, %cst_23 [1] : vector<8x2048xf32> to vector<8xf32>
    %63 = vector.shape_cast %62 : vector<8xf32> to vector<8x1xf32>
    %c10 = arith.constant 10 : index
    %c0_24 = arith.constant 0 : index
    %64 = vector.load %arg2[%c10, %c0_24] : memref<11x2048xf32, #tpu.memory_space<vmem>>, vector<1x2048xf32>
    %65 = vector.broadcast %64 : vector<1x2048xf32> to vector<8x2048xf32>
    %66 = arith.mulf %58, %65 : vector<8x2048xf32>
    %cst_25 = arith.constant dense<0.000000e+00> : vector<8xf32>
    %67 = vector.multi_reduction <add>, %66, %cst_25 [1] : vector<8x2048xf32> to vector<8xf32>
    %68 = vector.shape_cast %67 : vector<8xf32> to vector<8x1xf32>
    %69 = arith.subf %68, %63 : vector<8x1xf32>
    %70 = math.exp %69 : vector<8x1xf32>
    %cst_26 = arith.constant 1.000000e+00 : f32
    %71 = vector.broadcast %cst_26 : f32 to vector<8x1xf32>
    %72 = arith.addf %71, %70 : vector<8x1xf32>
    %73 = tpu.reciprocal %72 : vector<8x1xf32> -> vector<8x1xf32>
    %cst_27 = arith.constant 1.000000e+00 : f32
    %74 = vector.broadcast %cst_27 : f32 to vector<8x1xf32>
    %75 = arith.subf %74, %73 : vector<8x1xf32>
    %76 = tpu.iota {dimensions = array<i32: 1>} : vector<8x128xi32>
    %c0_i32 = arith.constant 0 : i32
    %77 = vector.broadcast %c0_i32 : i32 to vector<8x128xi32>
    %78 = arith.cmpi eq, %76, %77 : vector<8x128xi32>
    %c1_i32 = arith.constant 1 : i32
    %79 = vector.broadcast %c1_i32 : i32 to vector<8x128xi32>
    %80 = arith.cmpi eq, %76, %79 : vector<8x128xi32>
    %c2_i32 = arith.constant 2 : i32
    %81 = vector.broadcast %c2_i32 : i32 to vector<8x128xi32>
    %82 = arith.cmpi eq, %76, %81 : vector<8x128xi32>
    %c3_i32 = arith.constant 3 : i32
    %83 = vector.broadcast %c3_i32 : i32 to vector<8x128xi32>
    %84 = arith.cmpi eq, %76, %83 : vector<8x128xi32>
    %c4_i32 = arith.constant 4 : i32
    %85 = vector.broadcast %c4_i32 : i32 to vector<8x128xi32>
    %86 = arith.cmpi eq, %76, %85 : vector<8x128xi32>
    %c5_i32 = arith.constant 5 : i32
    %87 = vector.broadcast %c5_i32 : i32 to vector<8x128xi32>
    %88 = arith.cmpi eq, %76, %87 : vector<8x128xi32>
    %cst_28 = arith.constant 0.000000e+00 : f32
    %89 = vector.shape_cast %44 : vector<8x1xf32> to vector<8x1xf32>
    %90 = vector.broadcast %89 : vector<8x1xf32> to vector<8x128xf32>
    %91 = vector.broadcast %cst_28 : f32 to vector<8x128xf32>
    %92 = arith.select %88, %90, %91 : vector<8x128xi1>, vector<8x128xf32>
    %93 = vector.shape_cast %42 : vector<8x1xf32> to vector<8x1xf32>
    %94 = vector.broadcast %93 : vector<8x1xf32> to vector<8x128xf32>
    %95 = arith.select %86, %94, %92 : vector<8x128xi1>, vector<8x128xf32>
    %96 = vector.shape_cast %75 : vector<8x1xf32> to vector<8x1xf32>
    %97 = vector.broadcast %96 : vector<8x1xf32> to vector<8x128xf32>
    %98 = arith.select %84, %97, %95 : vector<8x128xi1>, vector<8x128xf32>
    %99 = vector.shape_cast %73 : vector<8x1xf32> to vector<8x1xf32>
    %100 = vector.broadcast %99 : vector<8x1xf32> to vector<8x128xf32>
    %101 = arith.select %82, %100, %98 : vector<8x128xi1>, vector<8x128xf32>
    %102 = vector.shape_cast %27 : vector<8x1xf32> to vector<8x1xf32>
    %103 = vector.broadcast %102 : vector<8x1xf32> to vector<8x128xf32>
    %104 = arith.select %80, %103, %101 : vector<8x128xi1>, vector<8x128xf32>
    %105 = vector.shape_cast %25 : vector<8x1xf32> to vector<8x1xf32>
    %106 = vector.broadcast %105 : vector<8x1xf32> to vector<8x128xf32>
    %107 = arith.select %78, %106, %104 : vector<8x128xi1>, vector<8x128xf32>
    %c0_29 = arith.constant 0 : index
    %c0_30 = arith.constant 0 : index
    %108 = vector.load %arg3[%c0_29, %c0_30] : memref<8x128xf32, #tpu.memory_space<vmem>>, vector<8x128xf32>
    tpu.vector_store %arg3[%c0_29, %c0_30], %107 {strides = array<i32>} : memref<8x128xf32, #tpu.memory_space<vmem>>, vector<8x128xf32>,
    return
  }
}

</mosaic_0001>

<bundles_post_ra>
// kernel: tpu_custom_call.1
= control target key start
LH: loop header
LB: loop body
LE: loop exit
PB: predicated region body
PF: predicated region fallthrough
CT: control target
= control target key end

     0   :  { %8 = vsyncpa [#allocation3], 0  ;;  %s2667_s0 = inlined_call_operand.vmem [shape: f32[8,1], index: 0, kind: input, shape index: {}]   ;;  %s2668_s1 = inlined_call_operand.vmem [shape: f32[8,1], index: 1, kind: input, shape index: {}]   ;;  %s2669_s2 = inlined_call_operand.hbm [shape: f32[11,2048], index: 2, kind: input, shape index: {}]   ;;  %s2670_s3 = inlined_call_operand.hbm [shape: f32[8,128], index: 3, kind: output, shape index: {}]  }
   0x1   :  { %9 = vsyncpa [#allocation4], 0  ;;  %s1470_s12 = smov [#allocation2]   ;;  %s1422_s16 = scalar_lea.hbm %s2669_s2, 4096 }
   0x2   :  { %s19_s13 = sshll.u32 %s1470_s12, 4  ;;  %p1423_p0 = scmp.ne.s32.totalorder %s2669_s2, %s1422_s16  ;;  %s20_s13 = int_to_ptr.vmem [resolvable:$true] %s19_s13 }
   0x3   :  { %p1426_p1 = scmp.lt.u32.totalorder %s1422_s16, %s2669_s2 }
   0x5   :  { %p1428_p2 = pnand %p1426_p1, %p1423_p0 }
   0x7   :  { %1431 = shalt.err (!%p1428_p2)
}
   0x8   :  { %s1432_s21 = scalar_lea.vmem %s20_s13, 4096  ;;  %p1437_p4 = scmp.lt.s32.totalorder %s20_s13, %s20_s13 }
   0x9   :  { %p1433_p3 = scmp.ne.s32.totalorder %s20_s13, %s1432_s21  ;;  %p1438_p5 = scmp.lt.s32.totalorder %s1432_s21, %s1432_s21 }
   0xb   :  { %p1439_p6 = por %p1438_p5, %p1437_p4 }
   0xd   :  { %p1440_p7 = pnand %p1439_p6, %p1433_p3 }
   0xf   :  { %1443 = shalt.err (!%p1440_p7)
}
  0x10   :  { %s1471_s22 = smov 2048   ;;  %s1472_s23 = smov 128  }
  0x11   :  { %25 = dma.hbm_to_vmem [thread:$0]  %s2669_s2, 4096, %s20_s13, [#allocation3], %s1471_s22, %s1471_s22, %s1472_s23  }
  0x12   :  { %1466 = dma.done.wait [#allocation3], 4096  }
  0x13   :  { %1467 = vsyncadd [#allocation3], 4294963200  ;;  %v1473_v0 = vmov 0   ;;  %v29_v1 = vld [vmem:[%s2667_s0] sm:$0xff]  ;;  %v2671_v3 = vlaneseq  ;;  %s1474_s0 = smov [#allocation5]  }
  0x14   :  { %1409 = vset.pattern.permute.xlu0 %v1473_v0  ;;  %v30_v2 = vld [vmem:[%s2668_s1] sm:$0xff]  ;;  %s1395_s1 = sshll.u32 %s1474_s0, 4  ;;  %s1396_s1 = int_to_ptr.vmem [resolvable:$true] %s1395_s1 }
  0x15   :  { %40 = vperm.xlu0 %1409, %v29_v1   ;;  %v46_v4 = vshrl.u32 %v2671_v3, 7  ;;  %v31_v5 = vld [vmem:[#allocation2] ss:$8 sm:$0xf]  ;;  %s1444_s2 = scalar_lea.vmem %s1396_s1, 128  ;;  %p1449_p9 = scmp.lt.s32.totalorder %s1396_s1, %s1396_s1 }
  0x16   :  { %v32_v6 = vld [vmem:[#allocation2] ss:$8 sm:$0xf0]  ;;  %v142_v17 = vld [vmem:[#allocation2 + $0x1] ss:$8 sm:$0xf]  ;;  %p1445_p8 = scmp.ne.s32.totalorder %s1396_s1, %s1444_s2  ;;  %p1450_p10 = scmp.lt.s32.totalorder %s1444_s2, %s1444_s2 }
  0x17   :  { %v1514_v7 = vsub.s32 0, %v46_v4  ;;  %v1516_v8 = vsub.s32 1, %v46_v4  ;;  %v1518_v9 = vsub.s32 2, %v46_v4  ;;  %v1520_v10 = vsub.s32 3, %v46_v4 }
  0x18   :  { %v35_v11 = vld [vmem:[#allocation2 + $0x40] ss:$8 sm:$0xf]  ;;  %v1522_v13 = vor.u32 %v32_v6, %v31_v5  ;;  %v1524_v14 = vsub.s32 4, %v46_v4  ;;  %v1526_v15 = vsub.s32 5, %v46_v4  ;;  %v1528_v16 = vsub.s32 6, %v46_v4  ;;  %p1451_p11 = por %p1450_p10, %p1449_p9 }
  0x19   :  { %883 = vperm.xlu0 %1409, %v30_v2   ;;  %v36_v12 = vld [vmem:[#allocation2 + $0x40] ss:$8 sm:$0xf0]  ;;  %v143_v18 = vld [vmem:[#allocation2 + $0x1] ss:$8 sm:$0xf0] }
  0x1a   :  { %v1530_v19 = vor.u32 %v36_v12, %v35_v11  ;;  %v1532_v20 = vsub.s32 7, %v46_v4  ;;  %v146_v21 = vld [vmem:[#allocation2 + $0x41] ss:$8 sm:$0xf]  ;;  %v48_v23 = vrot.slane %v1522_v13, %v1514_v7  ;;  %v52_v24 = vrot.slane %v1522_v13, %v1516_v8  ;;  %p1452_p12 = pnand %p1451_p11, %p1445_p8 }
  0x1b   :  { %v147_v22 = vld [vmem:[#allocation2 + $0x41] ss:$8 sm:$0xf0]  ;;  %v56_v25 = vrot.slane %v1522_v13, %v1518_v9  ;;  %v1540_v26 = vor.u32 %v143_v18, %v142_v17  ;;  %v60_v27 = vrot.slane %v1522_v13, %v1520_v10  ;;  %v64_v28 = vrot.slane %v1522_v13, %v1524_v14  ;;  %v516_v35 = vld [vmem:[#allocation2 + $0x4] ss:$8 sm:$0xf] }
  0x1c   :  { %v68_v29 = vrot.slane %v1522_v13, %v1526_v15  ;;  %v72_v30 = vrot.slane %v1522_v13, %v1528_v16  ;;  %v76_v31 = vrot.slane %v1522_v13, %v1532_v20  ;;  %v80_v32 = vrot.slane %v1530_v19, %v1514_v7  ;;  %v517_v36 = vld [vmem:[#allocation2 + $0x4] ss:$8 sm:$0xf0]  ;;  %v639_v47 = vld [vmem:[#allocation2 + $0x5] ss:$8 sm:$0xf] }
  0x1d   :  { %v84_v33 = vrot.slane %v1530_v19, %v1516_v8  ;;  %v1556_v34 = vor.u32 %v147_v22, %v146_v21  ;;  %v88_v37 = vrot.slane %v1530_v19, %v1518_v9  ;;  %v92_v38 = vrot.slane %v1530_v19, %v1520_v10  ;;  %v520_v41 = vld [vmem:[#allocation2 + $0x44] ss:$8 sm:$0xf]  ;;  %v640_v48 = vld [vmem:[#allocation2 + $0x5] ss:$8 sm:$0xf0] }
  0x1e   :  { %v96_v39 = vrot.slane %v1530_v19, %v1524_v14  ;;  %v100_v40 = vrot.slane %v1530_v19, %v1526_v15  ;;  %v521_v42 = vld [vmem:[#allocation2 + $0x44] ss:$8 sm:$0xf0]  ;;  %v104_v43 = vrot.slane %v1530_v19, %v1528_v16  ;;  %v154_v45 = vrot.slane %v1540_v26, %v1514_v7  ;;  %v643_v49 = vld [vmem:[#allocation2 + $0x45] ss:$8 sm:$0xf] }
  0x1f   :  { %v158_v46 = vrot.slane %v1540_v26, %v1516_v8  ;;  %v644_v50 = vld [vmem:[#allocation2 + $0x45] ss:$8 sm:$0xf0]  ;;  %v162_v51 = vrot.slane %v1540_v26, %v1518_v9  ;;  %v166_v52 = vrot.slane %v1540_v26, %v1520_v10  ;;  %v170_v53 = vrot.slane %v1540_v26, %v1524_v14  ;;  %v768_v55 = vld [vmem:[#allocation2 + $0x6] ss:$8 sm:$0xf] }
  0x20   :  { %v174_v54 = vrot.slane %v1540_v26, %v1526_v15  ;;  %v769_v56 = vld [vmem:[#allocation2 + $0x6] ss:$8 sm:$0xf0]  ;;  %v1588_v60 = vor.u32 %v517_v36, %v516_v35  ;;  %v1604_v11 = vor.u32 %v521_v42, %v520_v41  ;;  %v1606_v12 = vor.u32 %v640_v48, %v639_v47  ;;  %v874_v47 = vld [vmem:[#allocation2 + $0x7] ss:$8 sm:$0xf] }
  0x21   :  { %v772_v61 = vld [vmem:[#allocation2 + $0x46] ss:$8 sm:$0xf]  ;;  %v1608_v17 = vor.u32 %v644_v50, %v643_v49  ;;  %v1610_v18 = vor.u32 %v769_v56, %v768_v55  ;;  %v875_v6 = vld [vmem:[#allocation2 + $0x7] ss:$8 sm:$0xf0] }
  0x22   :  { %v773_v62 = vld [vmem:[#allocation2 + $0x46] ss:$8 sm:$0xf0]  ;;  %v528_v22 = vrot.slane %v1588_v60, %v1514_v7  ;;  %v532_v35 = vrot.slane %v1588_v60, %v1516_v8  ;;  %v878_v42 = vld [vmem:[#allocation2 + $0x47] ss:$8 sm:$0xf]  ;;  %v1684_v4 = vor.u32 %v875_v6, %v874_v47 }
  0x23   :  { %v1612_v21 = vor.u32 %v773_v62, %v772_v61  ;;  %v879_v62 = vld [vmem:[#allocation2 + $0x47] ss:$8 sm:$0xf0]  ;;  %v1001_v48 = vld [vmem:[#allocation2 + $0x80] ss:$8 sm:$0xf] }
  0x24   :  { %v1700_v47 = vor.u32 %v879_v62, %v878_v42  ;;  %v1002_v2 = vld [vmem:[#allocation2 + $0x80] ss:$8 sm:$0xf0]  ;;  %v264_v41 = vld [vmem:[#allocation2 + $0x2] ss:$8 sm:$0xf] }
  0x25   :  { %v1005_v6 = vld [vmem:[#allocation2 + $0xc0] ss:$8 sm:$0xf]  ;;  %v1724_v1 = vor.u32 %v1002_v2, %v1001_v48  ;;  %v265_v0 = vld [vmem:[#allocation2 + $0x2] ss:$8 sm:$0xf0] }
  0x26   :  { %v1006_v5 = vld [vmem:[#allocation2 + $0xc0] ss:$8 sm:$0xf0]  ;;  %v268_v62 = vld [vmem:[#allocation2 + $0x42] ss:$8 sm:$0xf] }
  0x27   :  { %v1740_v42 = vor.u32 %v1006_v5, %v1005_v6  ;;  %v1756_v6 = vor.u32 %v265_v0, %v264_v41  ;;  %v269_v50 = vld [vmem:[#allocation2 + $0x42] ss:$8 sm:$0xf0]  ;;  %v1123_v48 = vld [vmem:[#allocation2 + $0x81] ss:$8 sm:$0xf] }
  0x28   :  { %v1124_v63 = vld [vmem:[#allocation2 + $0x81] ss:$8 sm:$0xf0]  ;;  %v1780_v58 = vor.u32 %v269_v50, %v268_v62  ;;  %v392_v44 = vld [vmem:[#allocation2 + $0x43] ss:$8 sm:$0xf0] }
  0x29   :  { %v1127_v59 = vld [vmem:[#allocation2 + $0xc1] ss:$8 sm:$0xf]  ;;  %v1786_v3 = vor.u32 %v1124_v63, %v1123_v48  ;;  %v388_v63 = vld [vmem:[#allocation2 + $0x3] ss:$8 sm:$0xf0] }
  0x2a   :  { %v1128_v0 = vld [vmem:[#allocation2 + $0xc1] ss:$8 sm:$0xf0]  ;;  %2696 = vst [vmem:[#allocation8_spill] sm:$0xff] %v1780_v58 }
  0x2b   :  { %v1798_v41 = vor.u32 %v1128_v0, %v1127_v59  ;;  %v387_v0 = vld [vmem:[#allocation2 + $0x3] ss:$8 sm:$0xf]  ;;  %v1250_v56 = vld [vmem:[#allocation2 + $0xc2] ss:$8 sm:$0xf] }
  0x2c   :  { %v1838_v61 = vor.u32 %v388_v63, %v387_v0  ;;  %v391_v59 = vld [vmem:[#allocation2 + $0x43] ss:$8 sm:$0xf]  ;;  %v1246_v63 = vld [vmem:[#allocation2 + $0x82] ss:$8 sm:$0xf] }
  0x2d   :  { %v1247_v0 = vld [vmem:[#allocation2 + $0x82] ss:$8 sm:$0xf0]  ;;  %v1866_v36 = vor.u32 %v392_v44, %v391_v59 }
  0x2e   :  { %v1868_v2 = vor.u32 %v1247_v0, %v1246_v63  ;;  %v1251_v57 = vld [vmem:[#allocation2 + $0xc2] ss:$8 sm:$0xf0] }
  0x2f   :  { %2697 = vst [vmem:[#allocation9_spill] sm:$0xff] %v1866_v36 }
  0x94   :  { %v1830_v48 = vpop.permute.xlu0 %40 }
  0x95   :  { %v125_v49 = vmul.f32 %v48_v23, %v1830_v48  ;;  %v126_v5 = vmul.f32 %v52_v24, %v1830_v48  ;;  %v127_v55 = vmul.f32 %v56_v25, %v1830_v48  ;;  %v129_v25 = vmul.f32 %v64_v28, %v1830_v48 }
  0x96   :  { %v131_v63 = vmul.f32 %v72_v30, %v1830_v48  ;;  %v136_v13 = vmul.f32 %v92_v38, %v1830_v48  ;;  %v139_v38 = vmul.f32 %v104_v43, %v1830_v48  ;;  %v2702_v43 = vrot.slane %v1606_v12, %v1516_v8 }
  0x97   :  { %v231_v44 = vadd.f32 %v154_v45, %v125_v49  ;;  %v232_v59 = vadd.f32 %v158_v46, %v126_v5  ;;  %v128_v45 = vmul.f32 %v60_v27, %v1830_v48  ;;  %v1900_v46 = vor.u32 %v1251_v57, %v1250_v56 }
  0x98   :  { %v233_v57 = vadd.f32 %v162_v51, %v127_v55  ;;  %v130_v51 = vmul.f32 %v68_v29, %v1830_v48  ;;  %v235_v27 = vadd.f32 %v170_v53, %v129_v25  ;;  %v132_v25 = vmul.f32 %v76_v31, %v1830_v48 }
  0x99   :  { %2698 = vst [vmem:[#allocation10_spill] sm:$0xff] %v1900_v46  ;;  %v1919_v56 = vmax.f32 %v231_v44, 0.0  ;;  %v1921_v5 = vmax.f32 %v232_v59, 0.0  ;;  %v234_v55 = vadd.f32 %v166_v52, %v128_v45  ;;  %v137_v31 = vmul.f32 %v96_v39, %v1830_v48 }
  0x9a   :  { %v1955_v45 = vmax.f32 %v233_v57, 0.0  ;;  %v133_v57 = vmul.f32 %v80_v32, %v1830_v48  ;;  %v236_v32 = vadd.f32 %v174_v54, %v130_v51  ;;  %v2699_v53 = vrot.slane %v1540_v26, %v1528_v16 }
  0x9b   :  { %v605_v59 = vmul.f32 %v528_v22, %v1919_v56  ;;  %v606_v30 = vmul.f32 %v532_v35, %v1921_v5  ;;  %v134_v22 = vmul.f32 %v84_v33, %v1830_v48  ;;  %v135_v35 = vmul.f32 %v88_v37, %v1830_v48 }
  0x9c   :  { %v1994_v33 = vmax.f32 %v234_v55, 0.0  ;;  %v138_v37 = vmul.f32 %v100_v40, %v1830_v48  ;;  %v237_v39 = vadd.f32 %v2699_v53, %v131_v63  ;;  %v2007_v52 = vmax.f32 %v235_v27, 0.0 }
  0x9d   :  { %v2700_v54 = vrot.slane %v1588_v60, %v1518_v9  ;;  %v621_v55 = vadd.f32 %v606_v30, %v605_v59  ;;  %v2701_v40 = vrot.slane %v1606_v12, %v1514_v7  ;;  %v729_v44 = vmul.f32 %v2702_v43, %v1921_v5 }
  0x9e   :  { %v2703_v63 = vrot.slane %v1530_v19, %v1532_v20  ;;  %v2704_v53 = vrot.slane %v1540_v26, %v1532_v20  ;;  %v2705_v59 = vrot.slane %v1556_v34, %v1514_v7  ;;  %v2707_v43 = vrot.slane %v1556_v34, %v1518_v9 }
  0x9f   :  { %v607_v51 = vmul.f32 %v2700_v54, %v1955_v45  ;;  %v728_v29 = vmul.f32 %v2701_v40, %v1919_v56  ;;  %v2706_v40 = vrot.slane %v1556_v34, %v1516_v8  ;;  %v2037_v23 = vmax.f32 %v236_v32, 0.0 }
  0xa0   :  { %v140_v27 = vmul.f32 %v2703_v63, %v1830_v48  ;;  %v238_v54 = vadd.f32 %v2704_v53, %v132_v25  ;;  %v239_v30 = vadd.f32 %v2705_v59, %v133_v57  ;;  %v241_v24 = vadd.f32 %v2707_v43, %v135_v35 }
  0xa1   :  { %v240_v0 = vadd.f32 %v2706_v40, %v134_v22  ;;  %v2708_v19 = vrot.slane %v1588_v60, %v1520_v10  ;;  %v622_v25 = vadd.f32 %v621_v55, %v607_v51  ;;  %v2709_v63 = vrot.slane %v1556_v34, %v1520_v10 }
  0xa2   :  { %v2710_v53 = vrot.slane %v1556_v34, %v1524_v14  ;;  %v2711_v59 = vrot.slane %v1556_v34, %v1526_v15  ;;  %v2052_v32 = vmax.f32 %v237_v39, 0.0  ;;  %v2712_v40 = vrot.slane %v1588_v60, %v1524_v14 }
  0xa3   :  { %v608_v26 = vmul.f32 %v2708_v19, %v1994_v33  ;;  %v242_v57 = vadd.f32 %v2709_v63, %v136_v13  ;;  %v2713_v13 = vrot.slane %v1606_v12, %v1518_v9  ;;  %v744_v19 = vadd.f32 %v729_v44, %v728_v29 }
  0xa4   :  { %v243_v22 = vadd.f32 %v2710_v53, %v137_v31  ;;  %v244_v35 = vadd.f32 %v2711_v59, %v138_v37  ;;  %v609_v43 = vmul.f32 %v2712_v40, %v2007_v52  ;;  %v2714_v31 = vrot.slane %v1556_v34, %v1528_v16 }
  0xa5   :  { %v623_v51 = vadd.f32 %v622_v25, %v608_v26  ;;  %v730_v55 = vmul.f32 %v2713_v13, %v1955_v45  ;;  %v2715_v37 = vrot.slane %v1556_v34, %v1532_v20  ;;  %v2068_v53 = vmax.f32 %v238_v54, 0.0 }
  0xa6   :  { %v245_v63 = vadd.f32 %v2714_v31, %v139_v38  ;;  %v2070_v59 = vmax.f32 %v239_v30, 0.0  ;;  %v2718_v26 = vrot.slane %v1588_v60, %v1526_v15  ;;  %v2719_v44 = vrot.slane %v1606_v12, %v1520_v10 }
  0xa7   :  { %v246_v39 = vadd.f32 %v2715_v37, %v140_v27  ;;  %2716 = vst [vmem:[#allocation11_spill] sm:$0xff] %v2068_v53  ;;  %v624_v40 = vadd.f32 %v623_v51, %v609_v43  ;;  %v745_v38 = vadd.f32 %v744_v19, %v730_v55  ;;  %v2080_v13 = vmax.f32 %v240_v0, 0.0 }
  0xa8   :  { %2717 = vst [vmem:[#allocation12_spill] sm:$0xff] %v2070_v59  ;;  %v610_v25 = vmul.f32 %v2718_v26, %v2037_v23  ;;  %v731_v29 = vmul.f32 %v2719_v44, %v1994_v33  ;;  %v2082_v34 = vmax.f32 %v241_v24, 0.0  ;;  %v2084_v27 = vmax.f32 %v242_v57, 0.0 }
  0xa9   :  { %2720 = vst [vmem:[#allocation13_spill] sm:$0xff] %v2080_v13  ;;  %v2086_v54 = vmax.f32 %v243_v22, 0.0  ;;  %v2724_v30 = vrot.slane %v1588_v60, %v1528_v16  ;;  %v2725_v51 = vrot.slane %v1606_v12, %v1524_v14  ;;  %v2096_v0 = vmax.f32 %v244_v35, 0.0 }
  0xaa   :  { %2721 = vst [vmem:[#allocation14_spill] sm:$0xff] %v2082_v34  ;;  %2722 = vst [vmem:[#allocation15_spill] sm:$0xff] %v2084_v27  ;;  %v625_v43 = vadd.f32 %v624_v40, %v610_v25  ;;  %v746_v55 = vadd.f32 %v745_v38, %v731_v29  ;;  %v2098_v24 = vmax.f32 %v245_v63, 0.0  ;;  %v2100_v57 = vmax.f32 %v246_v39, 0.0 }
  0xab   :  { %2723 = vst [vmem:[#allocation16_spill] sm:$0xff] %v2086_v54  ;;  %v611_v31 = vmul.f32 %v2724_v30, %v2052_v32  ;;  %v732_v37 = vmul.f32 %v2725_v51, %v2007_v52  ;;  %2726 = vst [vmem:[#allocation17_spill] sm:$0xff] %v2096_v0  ;;  %v2729_v19 = vrot.slane %v1588_v60, %v1532_v20  ;;  %v2128_v51 = vpop.permute.xlu0 %883 }
  0xac   :  { %2727 = vst [vmem:[#allocation18_spill] sm:$0xff] %v2098_v24  ;;  %2728 = vst [vmem:[#allocation19_spill] sm:$0xff] %v2100_v57  ;;  %v2730_v40 = vrot.slane %v1606_v12, %v1526_v15  ;;  %v2731_v63 = vrot.slane %v1604_v11, %v1514_v7  ;;  %v2732_v29 = vrot.slane %v1604_v11, %v1516_v8 }
  0xad   :  { %v612_v26 = vmul.f32 %v2729_v19, %v2068_v53  ;;  %v626_v25 = vadd.f32 %v625_v43, %v611_v31  ;;  %v747_v35 = vadd.f32 %v746_v55, %v732_v37  ;;  %v2733_v60 = vrot.slane %v1604_v11, %v1518_v9 }
  0xae   :  { %v733_v44 = vmul.f32 %v2730_v40, %v2037_v23  ;;  %v613_v39 = vmul.f32 %v2731_v63, %v2070_v59  ;;  %v614_v38 = vmul.f32 %v2732_v29, %v2080_v13  ;;  %v2734_v31 = vrot.slane %v1604_v11, %v1520_v10 }
  0xaf   :  { %v615_v30 = vmul.f32 %v2733_v60, %v2082_v34  ;;  %v2735_v37 = vrot.slane %v1604_v11, %v1524_v14  ;;  %v627_v19 = vadd.f32 %v626_v25, %v612_v26  ;;  %v2736_v40 = vrot.slane %v1606_v12, %v1528_v16 }
  0xb0   :  { %v616_v43 = vmul.f32 %v2734_v31, %v2084_v27  ;;  %v748_v29 = vadd.f32 %v747_v35, %v733_v44  ;;  %v2737_v60 = vrot.slane %v1604_v11, %v1526_v15  ;;  %v2738_v31 = vrot.slane %v1604_v11, %v1528_v16 }
  0xb1   :  { %v617_v55 = vmul.f32 %v2735_v37, %v2086_v54  ;;  %v734_v63 = vmul.f32 %v2736_v40, %v2052_v32  ;;  %v2739_v26 = vrot.slane %v1604_v11, %v1532_v20  ;;  %v2740_v37 = vrot.slane %v1606_v12, %v1532_v20 }
  0xb2   :  { %v618_v22 = vmul.f32 %v2737_v60, %v2096_v0  ;;  %v619_v49 = vmul.f32 %v2738_v31, %v2098_v24  ;;  %v628_v35 = vadd.f32 %v627_v19, %v613_v39  ;;  %v2741_v40 = vrot.slane %v1608_v17, %v1514_v7 }
  0xb3   :  { %v620_v25 = vmul.f32 %v2739_v26, %v2100_v57  ;;  %v735_v44 = vmul.f32 %v2740_v37, %v2068_v53  ;;  %v2742_v31 = vrot.slane %v1608_v17, %v1516_v8  ;;  %v749_v62 = vadd.f32 %v748_v29, %v734_v63 }
  0xb4   :  { %v736_v60 = vmul.f32 %v2741_v40, %v2070_v59  ;;  %v2743_v11 = vrot.slane %v1608_v17, %v1518_v9  ;;  %v2744_v12 = vrot.slane %v1608_v17, %v1520_v10  ;;  %v2745_v19 = vrot.slane %v1684_v4, %v1514_v7 }
  0xb5   :  { %v737_v28 = vmul.f32 %v2742_v31, %v2080_v13  ;;  %v2746_v40 = vrot.slane %v1684_v4, %v1516_v8  ;;  %v629_v29 = vadd.f32 %v628_v35, %v614_v38  ;;  %v2747_v31 = vrot.slane %v1608_v17, %v1524_v14 }
  0xb6   :  { %v738_v26 = vmul.f32 %v2743_v11, %v2082_v34  ;;  %v739_v39 = vmul.f32 %v2744_v12, %v2084_v27  ;;  %v968_v37 = vmul.f32 %v2745_v19, %v2128_v51  ;;  %v2748_v12 = vrot.slane %v1608_v17, %v1526_v15 }
  0xb7   :  { %v969_v63 = vmul.f32 %v2746_v40, %v2128_v51  ;;  %v740_v11 = vmul.f32 %v2747_v31, %v2086_v54  ;;  %v750_v36 = vadd.f32 %v749_v62, %v735_v44  ;;  %v2749_v19 = vrot.slane %v1608_v17, %v1528_v16 }
  0xb8   :  { %v741_v50 = vmul.f32 %v2748_v12, %v2096_v0  ;;  %v2750_v38 = vrot.slane %v1608_v17, %v1532_v20  ;;  %v2751_v40 = vrot.slane %v1610_v18, %v1514_v7  ;;  %v2752_v12 = vrot.slane %v1610_v18, %v1516_v8 }
  0xb9   :  { %v742_v27 = vmul.f32 %v2749_v19, %v2098_v24  ;;  %v630_v44 = vadd.f32 %v629_v29, %v615_v30  ;;  %v751_v0 = vadd.f32 %v750_v36, %v736_v60  ;;  %v2753_v19 = vrot.slane %v1610_v18, %v1518_v9 }
  0xba   :  { %v743_v35 = vmul.f32 %v2750_v38, %v2100_v57  ;;  %v857_v31 = vmul.f32 %v2751_v40, %v1830_v48  ;;  %v858_v62 = vmul.f32 %v2752_v12, %v1830_v48  ;;  %v2754_v17 = vrot.slane %v1610_v18, %v1520_v10 }
  0xbb   :  { %v859_v24 = vmul.f32 %v2753_v19, %v1830_v48  ;;  %v2755_v40 = vrot.slane %v1610_v18, %v1524_v14  ;;  %v2756_v30 = vrot.slane %v1684_v4, %v1518_v9  ;;  %v631_v12 = vadd.f32 %v630_v44, %v616_v43 }
  0xbc   :  { %v860_v38 = vmul.f32 %v2754_v17, %v1830_v48  ;;  %v984_v60 = vadd.f32 %v968_v37, %v857_v31  ;;  %v985_v29 = vadd.f32 %v969_v63, %v858_v62  ;;  %v752_v54 = vadd.f32 %v751_v0, %v737_v28 }
  0xbd   :  { %v861_v57 = vmul.f32 %v2755_v40, %v1830_v48  ;;  %v970_v36 = vmul.f32 %v2756_v30, %v2128_v51  ;;  %v2757_v19 = vrot.slane %v1610_v18, %v1526_v15  ;;  %v2758_v17 = vrot.slane %v1610_v18, %v1528_v16 }
  0xbe   :  { %v2759_v40 = vrot.slane %v1610_v18, %v1532_v20  ;;  %v2760_v43 = vrot.slane %v1612_v21, %v1514_v7  ;;  %v2761_v0 = vrot.slane %v1612_v21, %v1516_v8  ;;  %v2762_v63 = vrot.slane %v1684_v4, %v1520_v10 }
  0xbf   :  { %v862_v46 = vmul.f32 %v2757_v19, %v1830_v48  ;;  %v863_v34 = vmul.f32 %v2758_v17, %v1830_v48  ;;  %v632_v62 = vadd.f32 %v631_v12, %v617_v55  ;;  %v753_v44 = vadd.f32 %v752_v54, %v738_v26 }
  0xc0   :  { %v864_v13 = vmul.f32 %v2759_v40, %v1830_v48  ;;  %v865_v28 = vmul.f32 %v2760_v43, %v1830_v48  ;;  %v866_v37 = vmul.f32 %v2761_v0, %v1830_v48  ;;  %v971_v31 = vmul.f32 %v2762_v63, %v2128_v51 }
  0xc1   :  { %v2763_v18 = vrot.slane %v1612_v21, %v1518_v9  ;;  %v2764_v19 = vrot.slane %v1612_v21, %v1520_v10  ;;  %v2765_v40 = vrot.slane %v1684_v4, %v1524_v14  ;;  %v986_v0 = vadd.f32 %v970_v36, %v859_v24 }
  0xc2   :  { %v2766_v55 = vrot.slane %v1724_v1, %v1514_v7  ;;  %v2767_v26 = vrot.slane %v1724_v1, %v1516_v8  ;;  %v633_v63 = vadd.f32 %v632_v62, %v618_v22  ;;  %v2769_v24 = vrot.slane %v1612_v21, %v1526_v15 }
  0xc3   :  { %v867_v30 = vmul.f32 %v2763_v18, %v1830_v48  ;;  %v868_v17 = vmul.f32 %v2764_v19, %v1830_v48  ;;  %v972_v43 = vmul.f32 %v2765_v40, %v2128_v51  ;;  %v754_v18 = vadd.f32 %v753_v44, %v739_v39 }
  0xc4   :  { %v2257_v54 = vadd.f32 %v2766_v55, %v984_v60  ;;  %v2262_v12 = vadd.f32 %v2767_v26, %v985_v29  ;;  %v2768_v19 = vrot.slane %v1612_v21, %v1524_v14  ;;  %v870_v36 = vmul.f32 %v2769_v24, %v1830_v48 }
  0xc5   :  { %v2770_v60 = vrot.slane %v1612_v21, %v1528_v16  ;;  %v2771_v22 = vrot.slane %v1612_v21, %v1532_v20  ;;  %v2772_v29 = vrot.slane %v1684_v4, %v1526_v15  ;;  %v987_v44 = vadd.f32 %v971_v31, %v860_v38 }
  0xc6   :  { %v869_v58 = vmul.f32 %v2768_v19, %v1830_v48  ;;  %v634_v55 = vadd.f32 %v633_v63, %v619_v49  ;;  %v755_v26 = vadd.f32 %v754_v18, %v740_v11  ;;  %v2773_v19 = vrot.slane %v1684_v4, %v1528_v16 }
  0xc7   :  { %v871_v40 = vmul.f32 %v2770_v60, %v1830_v48  ;;  %v872_v39 = vmul.f32 %v2771_v22, %v1830_v48  ;;  %v973_v62 = vmul.f32 %v2772_v29, %v2128_v51  ;;  %v2774_v60 = vrot.slane %v1684_v4, %v1532_v20 }
  0xc8   :  { %v974_v24 = vmul.f32 %v2773_v19, %v2128_v51  ;;  %v988_v21 = vadd.f32 %v972_v43, %v861_v57  ;;  %v2775_v48 = vrot.slane %v1724_v1, %v1518_v9  ;;  %v1106_v38 = vmax.f32 %v2257_v54, 0.0 }
  0xc9   :  { %v975_v59 = vmul.f32 %v2774_v60, %v2128_v51  ;;  %v1107_v49 = vmax.f32 %v2262_v12, 0.0  ;;  %v635_v11 = vadd.f32 %v634_v55, %v620_v25  ;;  %v756_v31 = vadd.f32 %v755_v26, %v741_v50 }
  0xca   :  { %v2295_v22 = vadd.f32 %v2775_v48, %v986_v0  ;;  %v2776_v63 = vrot.slane %v1700_v47, %v1514_v7  ;;  %v2777_v4 = vrot.slane %v1700_v47, %v1516_v8  ;;  %v2778_v43 = vrot.slane %v1700_v47, %v1518_v9 }
  0xcb   :  { %v2779_v25 = vrot.slane %v1700_v47, %v1520_v10  ;;  %v989_v54 = vadd.f32 %v973_v62, %v862_v46  ;;  %v2780_v12 = vrot.slane %v1724_v1, %v1520_v10  ;;  %636 = vadd.xlane.f32.xlu1 %v635_v11  ;;  %v757_v55 = vadd.f32 %v756_v31, %v742_v27 }
  0xcc   :  { %v976_v18 = vmul.f32 %v2776_v63, %v2128_v51  ;;  %v977_v57 = vmul.f32 %v2777_v4, %v2128_v51  ;;  %v978_v0 = vmul.f32 %v2778_v43, %v2128_v51  ;;  %v2781_v26 = vrot.slane %v1700_v47, %v1524_v14 }
  0xcd   :  { %v979_v50 = vmul.f32 %v2779_v25, %v2128_v51  ;;  %v2318_v29 = vadd.f32 %v2780_v12, %v987_v44  ;;  %v2782_v60 = vrot.slane %v1700_v47, %v1526_v15  ;;  %v990_v63 = vadd.f32 %v974_v24, %v863_v34 }
  0xce   :  { %v980_v19 = vmul.f32 %v2781_v26, %v2128_v51  ;;  %v2783_v46 = vrot.slane %v1724_v1, %v1524_v14  ;;  %v1108_v44 = vmax.f32 %v2295_v22, 0.0  ;;  %v2784_v27 = vrot.slane %v1786_v3, %v1514_v7 }
  0xcf   :  { %v981_v48 = vmul.f32 %v2782_v60, %v2128_v51  ;;  %v2785_v31 = vrot.slane %v1786_v3, %v1516_v8  ;;  %v758_v43 = vadd.f32 %v757_v55, %v743_v35  ;;  %v2786_v34 = vrot.slane %v1700_v47, %v1528_v16 }
  0xd0   :  { %v2331_v62 = vadd.f32 %v2783_v46, %v988_v21  ;;  %v1212_v11 = vmul.f32 %v2784_v27, %v1106_v38  ;;  %v2787_v21 = vrot.slane %v1700_v47, %v1532_v20  ;;  %v991_v22 = vadd.f32 %v975_v59, %v864_v13 }
  0xd1   :  { %v1213_v4 = vmul.f32 %v2785_v31, %v1107_v49  ;;  %v982_v24 = vmul.f32 %v2786_v34, %v2128_v51  ;;  %v992_v12 = vadd.f32 %v976_v18, %v865_v28  ;;  %v993_v26 = vadd.f32 %v977_v57, %v866_v37  ;;  %759 = vadd.xlane.f32.xlu1 %v758_v43 }
  0xd2   :  { %v983_v25 = vmul.f32 %v2787_v21, %v2128_v51  ;;  %v2788_v60 = vrot.slane %v1724_v1, %v1526_v15  ;;  %v1109_v35 = vmax.f32 %v2318_v29, 0.0  ;;  %v994_v55 = vadd.f32 %v978_v0, %v867_v30 }
  0xd3   :  { %v995_v27 = vadd.f32 %v979_v50, %v868_v17  ;;  %v996_v31 = vadd.f32 %v980_v19, %v869_v58  ;;  %v997_v34 = vadd.f32 %v981_v48, %v870_v36  ;;  %v2789_v53 = vrot.slane %v1724_v1, %v1528_v16 }
  0xd4   :  { %v2351_v46 = vadd.f32 %v2788_v60, %v989_v54  ;;  %v1110_v59 = vmax.f32 %v2331_v62, 0.0  ;;  %v2790_v13 = vrot.slane %v1786_v3, %v1518_v9  ;;  %v1228_v28 = vadd.f32 %v1213_v4, %v1212_v11 }
  0xd5   :  { %v2357_v47 = vadd.f32 %v2789_v53, %v990_v63  ;;  %v998_v37 = vadd.f32 %v982_v24, %v871_v40  ;;  %v2791_v18 = vrot.slane %v1724_v1, %v1532_v20  ;;  %v2792_v58 = vrot.slane %v1756_v6, %v1514_v7 }
  0xd6   :  { %v1214_v51 = vmul.f32 %v2790_v13, %v1108_v44  ;;  %v2793_v53 = vrot.slane %v1756_v6, %v1516_v8  ;;  %v999_v57 = vadd.f32 %v983_v25, %v872_v39  ;;  %v1111_v0 = vmax.f32 %v2351_v46, 0.0 }
  0xd7   :  { %v2366_v30 = vadd.f32 %v2791_v18, %v991_v22  ;;  %v353_v17 = vmul.f32 %v2792_v58, %v1919_v56  ;;  %v2794_v40 = vrot.slane %v1786_v3, %v1520_v10  ;;  %v2795_v54 = vrot.slane %v1740_v42, %v1514_v7 }
  0xd8   :  { %v354_v36 = vmul.f32 %v2793_v53, %v1921_v5  ;;  %v1229_v1 = vadd.f32 %v1228_v28, %v1214_v51  ;;  %v2796_v19 = vrot.slane %v1740_v42, %v1516_v8  ;;  %v2797_v39 = vrot.slane %v1740_v42, %v1518_v9 }
  0xd9   :  { %v1215_v50 = vmul.f32 %v2794_v40, %v1109_v35  ;;  %v2383_v29 = vadd.f32 %v2795_v54, %v992_v12  ;;  %v2798_v62 = vrot.slane %v1740_v42, %v1520_v10  ;;  %v2799_v4 = vrot.slane %v1740_v42, %v1524_v14 }
  0xda   :  { %v2388_v48 = vadd.f32 %v2796_v19, %v993_v26  ;;  %v2393_v63 = vadd.f32 %v2797_v39, %v994_v55  ;;  %v1112_v24 = vmax.f32 %v2357_v47, 0.0  ;;  %v2800_v21 = vrot.slane %v1786_v3, %v1524_v14 }
  0xdb   :  { %v2398_v11 = vadd.f32 %v2798_v62, %v995_v27  ;;  %v2403_v43 = vadd.f32 %v2799_v4, %v996_v31  ;;  %v1230_v22 = vadd.f32 %v1229_v1, %v1215_v50  ;;  %v2801_v12 = vrot.slane %v1740_v42, %v1526_v15 }
  0xdc   :  { %v1216_v25 = vmul.f32 %v2800_v21, %v1110_v59  ;;  %v1113_v60 = vmax.f32 %v2366_v30, 0.0  ;;  %v2802_v46 = vrot.slane %v1756_v6, %v1518_v9  ;;  %v369_v27 = vadd.f32 %v354_v36, %v353_v17 }
  0xdd   :  { %v2412_v26 = vadd.f32 %v2801_v12, %v997_v34  ;;  %v2803_v31 = vrot.slane %v1786_v3, %v1526_v15  ;;  %v2804_v51 = vrot.slane %v1868_v2, %v1514_v7  ;;  %v2805_v34 = vrot.slane %v1868_v2, %v1516_v8 }
  0xde   :  { %v355_v55 = vmul.f32 %v2802_v46, %v1955_v45  ;;  %v1231_v13 = vadd.f32 %v1230_v22, %v1216_v25  ;;  %v2806_v30 = vrot.slane %v1740_v42, %v1528_v16  ;;  %v2807_v17 = vrot.slane %v1740_v42, %v1532_v20 }
  0xdf   :  { %v1217_v47 = vmul.f32 %v2803_v31, %v1111_v0  ;;  %v1335_v28 = vmul.f32 %v2804_v51, %v1106_v38  ;;  %v1336_v18 = vmul.f32 %v2805_v34, %v1107_v49  ;;  %v2808_v36 = vrot.slane %v1756_v6, %v1520_v10 }
  0xe0   :  { %v2431_v58 = vadd.f32 %v2806_v30, %v998_v37  ;;  %v2436_v53 = vadd.f32 %v2807_v17, %v999_v57  ;;  %v370_v38 = vadd.f32 %v369_v27, %v355_v55  ;;  %v1114_v50 = vmax.f32 %v2383_v29, 0.0 }
  0xe1   :  { %v356_v40 = vmul.f32 %v2808_v36, %v1994_v33  ;;  %v1115_v49 = vmax.f32 %v2388_v48, 0.0  ;;  %v2809_v1 = vrot.slane %v1786_v3, %v1528_v16  ;;  %v1232_v54 = vadd.f32 %v1231_v13, %v1217_v47 }
  0xe2   :  { %v1116_v19 = vmax.f32 %v2393_v63, 0.0  ;;  %v1117_v42 = vmax.f32 %v2398_v11, 0.0  ;;  %v2810_v57 = vrot.slane %v1756_v6, %v1524_v14  ;;  %v2811_v29 = vrot.slane %v1786_v3, %v1532_v20 }
  0xe3   :  { %v1218_v37 = vmul.f32 %v2809_v1, %v1112_v24  ;;  %v371_v62 = vadd.f32 %v370_v38, %v356_v40  ;;  %v2812_v25 = vrot.slane %v1868_v2, %v1518_v9  ;;  %v1351_v12 = vadd.f32 %v1336_v18, %v1335_v28 }
  0xe4   :  { %v357_v39 = vmul.f32 %v2810_v57, %v2007_v52  ;;  %v1219_v4 = vmul.f32 %v2811_v29, %v1113_v60  ;;  %v1118_v46 = vmax.f32 %v2403_v43, 0.0  ;;  %v1119_v55 = vmax.f32 %v2412_v26, 0.0 }
  0xe5   :  { %v1233_v21 = vadd.f32 %v1232_v54, %v1218_v37  ;;  %v1337_v22 = vmul.f32 %v2812_v25, %v1108_v44  ;;  %v2813_v27 = vrot.slane %v1756_v6, %v1526_v15  ;;  %v2814_v3 = vrot.slane %v1798_v41, %v1514_v7 }
  0xe6   :  { %v372_v47 = vadd.f32 %v371_v62, %v357_v39  ;;  %v2815_v34 = vrot.slane %v1868_v2, %v1520_v10  ;;  %v2816_v18 = vrot.slane %v1756_v6, %v1528_v16  ;;  %v2817_v36 = vrot.slane %v1838_v61, %v1514_v7 }
  0xe7   :  { %v358_v31 = vmul.f32 %v2813_v27, %v2037_v23  ;;  %v1220_v13 = vmul.f32 %v2814_v3, %v1114_v50  ;;  %v1234_v51 = vadd.f32 %v1233_v21, %v1219_v4  ;;  %v1352_v28 = vadd.f32 %v1351_v12, %v1337_v22  ;;  %v2821_v4 = vld [vmem:[#allocation11_spill] sm:$0xff]  ;;  %v2825_v3 = vld [vmem:[#allocation12_spill] sm:$0xff] }
  0xe8   :  { %v1338_v44 = vmul.f32 %v2815_v34, %v1109_v35  ;;  %v359_v30 = vmul.f32 %v2816_v18, %v2052_v32  ;;  %v476_v40 = vmul.f32 %v2817_v36, %v1919_v56  ;;  %v2818_v38 = vrot.slane %v1838_v61, %v1516_v8 }
  0xe9   :  { %v373_v17 = vadd.f32 %v372_v47, %v358_v31  ;;  %v2819_v35 = vrot.slane %v1798_v41, %v1516_v8  ;;  %v1235_v54 = vadd.f32 %v1234_v51, %v1220_v13  ;;  %v2820_v57 = vrot.slane %v1868_v2, %v1524_v14  ;;  %v2826_v13 = vld [vmem:[#allocation8_spill] sm:$0xff] }
  0xea   :  { %v477_v1 = vmul.f32 %v2818_v38, %v1921_v5  ;;  %v1353_v62 = vadd.f32 %v1352_v28, %v1338_v44  ;;  %v1120_v29 = vmax.f32 %v2431_v58, 0.0  ;;  %v1121_v56 = vmax.f32 %v2436_v53, 0.0 }
  0xeb   :  { %v1221_v37 = vmul.f32 %v2819_v35, %v1115_v49  ;;  %v1339_v39 = vmul.f32 %v2820_v57, %v1110_v59  ;;  %v2822_v5 = vrot.slane %v1756_v6, %v1532_v20  ;;  %v374_v25 = vadd.f32 %v373_v17, %v359_v30 }
  0xec   :  { %v2823_v22 = vrot.slane %v1798_v41, %v1518_v9  ;;  %v2824_v59 = vrot.slane %v1868_v2, %v1526_v15  ;;  %v2827_v51 = vrot.slane %v2826_v13, %v1514_v7  ;;  %v2828_v44 = vrot.slane %v1838_v61, %v1518_v9 }
  0xed   :  { %v360_v21 = vmul.f32 %v2822_v5, %v2821_v4  ;;  %v1236_v27 = vadd.f32 %v1235_v54, %v1221_v37  ;;  %v1354_v47 = vadd.f32 %v1353_v62, %v1339_v39  ;;  %v492_v18 = vadd.f32 %v477_v1, %v476_v40  ;;  %v2831_v37 = vld [vmem:[#allocation13_spill] sm:$0xff] }
  0xee   :  { %v1222_v12 = vmul.f32 %v2823_v22, %v1116_v19  ;;  %v1340_v31 = vmul.f32 %v2824_v59, %v1111_v0  ;;  %v361_v34 = vmul.f32 %v2827_v51, %v2825_v3  ;;  %v478_v28 = vmul.f32 %v2828_v44, %v1955_v45 }
  0xef   :  { %v375_v6 = vadd.f32 %v374_v25, %v360_v21  ;;  %v2829_v30 = vrot.slane %v1798_v41, %v1520_v10  ;;  %v2830_v36 = vrot.slane %v1868_v2, %v1528_v16  ;;  %v2832_v54 = vrot.slane %v2826_v13, %v1516_v8 }
  0xf0   :  { %v1237_v0 = vadd.f32 %v1236_v27, %v1222_v12  ;;  %v1355_v35 = vadd.f32 %v1354_v47, %v1340_v31  ;;  %v2833_v45 = vrot.slane %v1838_v61, %v1520_v10  ;;  %v493_v1 = vadd.f32 %v492_v18, %v478_v28  ;;  %v2836_v12 = vld [vmem:[#allocation14_spill] sm:$0xff] }
  0xf1   :  { %v1223_v17 = vmul.f32 %v2829_v30, %v1117_v42  ;;  %v1341_v38 = vmul.f32 %v2830_v36, %v1112_v24  ;;  %v362_v57 = vmul.f32 %v2832_v54, %v2831_v37  ;;  %v376_v39 = vadd.f32 %v375_v6, %v361_v34  ;;  %v2840_v6 = vld [vmem:[#allocation10_spill] sm:$0xff]  ;;  %v2842_v30 = vld [vmem:[#allocation15_spill] sm:$0xff] }
  0xf2   :  { %v479_v40 = vmul.f32 %v2833_v45, %v1994_v33  ;;  %v2834_v62 = vrot.slane %v1798_v41, %v1524_v14  ;;  %v2835_v21 = vrot.slane %v1868_v2, %v1532_v20  ;;  %v2837_v27 = vrot.slane %v2826_v13, %v1518_v9 }
  0xf3   :  { %v1238_v24 = vadd.f32 %v1237_v0, %v1223_v17  ;;  %v1356_v22 = vadd.f32 %v1355_v35, %v1341_v38  ;;  %v377_v31 = vadd.f32 %v376_v39, %v362_v57  ;;  %v2838_v33 = vrot.slane %v1838_v61, %v1524_v14 }
  0xf4   :  { %v1224_v5 = vmul.f32 %v2834_v62, %v1118_v46  ;;  %v1342_v25 = vmul.f32 %v2835_v21, %v1113_v60  ;;  %v363_v59 = vmul.f32 %v2837_v27, %v2836_v12  ;;  %v494_v51 = vadd.f32 %v493_v1, %v479_v40  ;;  %v2847_v1 = vld [vmem:[#allocation16_spill] sm:$0xff] }
  0xf5   :  { %v480_v47 = vmul.f32 %v2838_v33, %v2007_v52  ;;  %v2839_v34 = vrot.slane %v1798_v41, %v1526_v15  ;;  %v2841_v44 = vrot.slane %v2840_v6, %v1514_v7  ;;  %v2843_v17 = vrot.slane %v2826_v13, %v1520_v10  ;;  %v2852_v33 = vld [vmem:[#allocation17_spill] sm:$0xff] }
  0xf6   :  { %v1239_v60 = vadd.f32 %v1238_v24, %v1224_v5  ;;  %v1357_v18 = vadd.f32 %v1356_v22, %v1342_v25  ;;  %v378_v36 = vadd.f32 %v377_v31, %v363_v59  ;;  %v2844_v52 = vrot.slane %v1838_v61, %v1526_v15 }
  0xf7   :  { %v1225_v2 = vmul.f32 %v2839_v34, %v1119_v55  ;;  %v1343_v28 = vmul.f32 %v2841_v44, %v1114_v50  ;;  %v364_v0 = vmul.f32 %v2843_v17, %v2842_v30  ;;  %v495_v35 = vadd.f32 %v494_v51, %v480_v47 }
  0xf8   :  { %v481_v38 = vmul.f32 %v2844_v52, %v2037_v23  ;;  %v2845_v54 = vrot.slane %v1798_v41, %v1528_v16  ;;  %v2846_v39 = vrot.slane %v2840_v6, %v1516_v8  ;;  %v2848_v62 = vrot.slane %v2826_v13, %v1524_v14 }
  0xf9   :  { %v1240_v50 = vadd.f32 %v1239_v60, %v1225_v2  ;;  %v1358_v40 = vadd.f32 %v1357_v18, %v1343_v28  ;;  %v379_v5 = vadd.f32 %v378_v36, %v364_v0  ;;  %v2849_v24 = vrot.slane %v1838_v61, %v1528_v16  ;;  %v2856_v18 = vld [vmem:[#allocation18_spill] sm:$0xff] }
  0xfa   :  { %v1226_v57 = vmul.f32 %v2845_v54, %v1120_v29  ;;  %v1344_v45 = vmul.f32 %v2846_v39, %v1115_v49  ;;  %v365_v23 = vmul.f32 %v2848_v62, %v2847_v1  ;;  %v496_v25 = vadd.f32 %v495_v35, %v481_v38 }
  0xfb   :  { %v482_v21 = vmul.f32 %v2849_v24, %v2052_v32  ;;  %v2850_v48 = vrot.slane %v1798_v41, %v1532_v20  ;;  %v2851_v27 = vrot.slane %v2840_v6, %v1518_v9  ;;  %v2853_v47 = vrot.slane %v2826_v13, %v1526_v15 }
  0xfc   :  { %v1241_v49 = vadd.f32 %v1240_v50, %v1226_v57  ;;  %v1359_v31 = vadd.f32 %v1358_v40, %v1344_v45  ;;  %v380_v51 = vadd.f32 %v379_v5, %v365_v23  ;;  %v2854_v34 = vrot.slane %v1838_v61, %v1532_v20  ;;  %v2858_v61 = vld [vmem:[#allocation9_spill] sm:$0xff]  ;;  %v2861_v50 = vld [vmem:[#allocation19_spill] sm:$0xff] }
  0xfd   :  { %v1227_v22 = vmul.f32 %v2850_v48, %v1121_v56  ;;  %v1345_v59 = vmul.f32 %v2851_v27, %v1116_v19  ;;  %v366_v32 = vmul.f32 %v2853_v47, %v2852_v33  ;;  %v497_v2 = vadd.f32 %v496_v25, %v482_v21 }
  0xfe   :  { %v483_v41 = vmul.f32 %v2854_v34, %v2821_v4  ;;  %v1310_v63 = vrot.slane %v2840_v6, %v1526_v15  ;;  %v2855_v19 = vrot.slane %v2840_v6, %v1520_v10  ;;  %v2857_v17 = vrot.slane %v2826_v13, %v1528_v16 }
  0xff   :  { %v1242_v60 = vadd.f32 %v1241_v49, %v1227_v22  ;;  %v1360_v28 = vadd.f32 %v1359_v31, %v1345_v59  ;;  %v381_v36 = vadd.f32 %v380_v51, %v366_v32  ;;  %v2859_v4 = vrot.slane %v2858_v61, %v1514_v7 }
 0x100   :  { %v1346_v44 = vmul.f32 %v2855_v19, %v1117_v42  ;;  %v367_v0 = vmul.f32 %v2857_v17, %v2856_v18  ;;  %v498_v38 = vadd.f32 %v497_v2, %v483_v41  ;;  %v1314_v11 = vrot.slane %v2840_v6, %v1528_v16 }
 0x101   :  { %v484_v52 = vmul.f32 %v2859_v4, %v2825_v3  ;;  %1243 = vadd.xlane.f32.xlu0 %v1242_v60  ;;  %v2860_v42 = vrot.slane %v2840_v6, %v1524_v14  ;;  %v443_v57 = vrot.slane %v2858_v61, %v1520_v10  ;;  %v2862_v7 = vrot.slane %v2826_v13, %v1532_v20 }
 0x102   :  { %v1361_v54 = vadd.f32 %v1360_v28, %v1346_v44  ;;  %v382_v39 = vadd.f32 %v381_v36, %v367_v0  ;;  %v2863_v45 = vrot.slane %v2858_v61, %v1516_v8  ;;  %v1318_v62 = vrot.slane %v2840_v6, %v1532_v20 }
 0x103   :  { %v1347_v35 = vmul.f32 %v2860_v42, %v1118_v46  ;;  %v368_v3 = vmul.f32 %v2862_v7, %v2861_v50  ;;  %v499_v43 = vadd.f32 %v498_v38, %v484_v52  ;;  %v1348_v46 = vmul.f32 %v1310_v63, %v1119_v55 }
 0x104   :  { %v485_v40 = vmul.f32 %v2863_v45, %v2831_v37  ;;  %v447_v5 = vrot.slane %v2858_v61, %v1524_v14  ;;  %v2864_v13 = vrot.slane %v2858_v61, %v1518_v9  ;;  %v1349_v8 = vmul.f32 %v1314_v11, %v1120_v29 }
 0x105   :  { %v1362_v23 = vadd.f32 %v1361_v54, %v1347_v35  ;;  %v383_v10 = vadd.f32 %v382_v39, %v368_v3  ;;  %v451_v26 = vrot.slane %v2858_v61, %v1526_v15  ;;  %v487_v55 = vmul.f32 %v443_v57, %v2842_v30 }
 0x106   :  { %v486_v24 = vmul.f32 %v2864_v13, %v2836_v12  ;;  %v500_v21 = vadd.f32 %v499_v43, %v485_v40  ;;  %v1350_v14 = vmul.f32 %v1318_v62, %v1121_v56  ;;  %v455_v9 = vrot.slane %v2858_v61, %v1528_v16 }
 0x107   :  { %v1363_v37 = vadd.f32 %v1362_v23, %v1348_v46  ;;  %384 = vadd.xlane.f32.xlu1 %v383_v10  ;;  %v488_v12 = vmul.f32 %v447_v5, %v2847_v1  ;;  %v459_v29 = vrot.slane %v2858_v61, %v1532_v20  ;;  %v489_v22 = vmul.f32 %v451_v26, %v2852_v33 }
 0x108   :  { %v501_v6 = vadd.f32 %v500_v21, %v486_v24  ;;  %v490_v30 = vmul.f32 %v455_v9, %v2856_v18  ;;  %v2865_v0 = vlaneseq }
 0x109   :  { %v1364_v25 = vadd.f32 %v1363_v37, %v1349_v8  ;;  %v491_v53 = vmul.f32 %v459_v29, %v2861_v50 }
 0x10a   :  { %v502_v48 = vadd.f32 %v501_v6, %v487_v55  ;;  %v1375_v36 = vand.u32 127, %v2865_v0 }
 0x10b   :  { %v1365_v58 = vadd.f32 %v1364_v25, %v1350_v14 }
 0x10c   :  { %v503_v15 = vadd.f32 %v502_v48, %v488_v12  ;;  %vm1381_vm0 = vcmp.eq.s32.totalorder %v1375_v36, 5  ;;  %vm1380_vm1 = vcmp.eq.s32.totalorder %v1375_v36, 4  ;;  %vm1379_vm2 = vcmp.eq.s32.totalorder %v1375_v36, 3 }
 0x10d   :  { %1366 = vadd.xlane.f32.xlu1 %v1365_v58  ;;  %vm1378_vm3 = vcmp.eq.s32.totalorder %v1375_v36, 2  ;;  %vm1377_vm4 = vcmp.eq.s32.totalorder %v1375_v36, 1  ;;  %vm1376_vm5 = vcmp.eq.s32.totalorder %v1375_v36, 0 }
 0x10e   :  { %v504_v49 = vadd.f32 %v503_v15, %v489_v22 }
 0x110   :  { %v505_v56 = vadd.f32 %v504_v49, %v490_v30 }
 0x112   :  { %v506_v27 = vadd.f32 %v505_v56, %v491_v53 }
 0x114   :  { %507 = vadd.xlane.f32.xlu1 %v506_v27 }
 0x158   :  { %v637_v16 = vpop.xlane.xlu1 %636 }
 0x15e   :  { %v760_v59 = vpop.xlane.xlu1 %759 }
 0x15f   :  { %v761_v1 = vsub.f32 %v760_v59, %v637_v16 }
 0x161   :  { %v762_v31 = vmul.f32 1.442695, %v761_v1 }
 0x163   :  { %1410 = vpow2.f32 %v762_v31 }
 0x16d   :  { %v1411_v34 = vpop.eup %1410 }
 0x16e   :  { %v764_v60 = vadd.f32 1.0, %v1411_v34 }
 0x18e   :  { %v1244_v32 = vpop.xlane.xlu0 %1243 }
 0x194   :  { %v385_v47 = vpop.xlane.xlu1 %384 }
 0x19a   :  { %v1367_v20 = vpop.xlane.xlu1 %1366 }
 0x19b   :  { %v1368_v51 = vsub.f32 %v1367_v20, %v1244_v32 }
 0x19d   :  { %v1369_v33 = vmul.f32 1.442695, %v1368_v51 }
 0x19f   :  { %1412 = vpow2.f32 %v1369_v33 }
 0x1a1   :  { %v508_v41 = vpop.xlane.xlu1 %507 }
 0x1a2   :  { %v509_v2 = vsub.f32 %v508_v41, %v385_v47 }
 0x1a4   :  { %v510_v63 = vmul.f32 1.442695, %v509_v2 }
 0x1a6   :  { %1414 = vpow2.f32 %v510_v63 }
 0x1a7   :  { %1416 = vrcp.f32 %v764_v60 }
 0x1a9   :  { %v1413_v19 = vpop.eup %1412 }
 0x1aa   :  { %v1371_v44 = vadd.f32 1.0, %v1413_v19 }
 0x1ac   :  { %1418 = vrcp.f32 %v1371_v44 }
 0x1b0   :  { %v1415_v28 = vpop.eup %1414 }
 0x1b1   :  { %v1417_v18 = vpop.eup %1416  ;;  %v512_v17 = vadd.f32 1.0, %v1415_v28 }
 0x1b2   :  { %v766_v61 = vsub.f32 1.0, %v1417_v18 }
 0x1b3   :  { %1420 = vrcp.f32 %v512_v17 }
 0x1b4   :  { %v1382_v38 = vsel %vm1381_vm0, %v766_v61, 0.0 }
 0x1b5   :  { %v1383_v11 = vsel %vm1380_vm1, %v1417_v18, %v1382_v38 }
 0x1b6   :  { %v1419_v4 = vpop.eup %1418 }
 0x1b7   :  { %v1373_v52 = vsub.f32 1.0, %v1419_v4 }
 0x1b9   :  { %v1384_v42 = vsel %vm1379_vm2, %v1373_v52, %v1383_v11 }
 0x1ba   :  { %v1385_v57 = vsel %vm1378_vm3, %v1419_v4, %v1384_v42 }
 0x1bd   :  { %v1421_v35 = vpop.eup %1420 }
 0x1be   :  { %v514_v54 = vsub.f32 1.0, %v1421_v35 }
 0x1c0   :  { %v1386_v50 = vsel %vm1377_vm4, %v514_v54, %v1385_v57 }
 0x1c1   :  { %v1387_v7 = vsel %vm1376_vm5, %v1421_v35, %v1386_v50 }
 0x1c2   :  { %1388 = vst [vmem:[#allocation5] sm:$0xff] %v1387_v7 }
 0x1c3   :  { %1455 = shalt.err (!%p1452_p12)
}
 0x1c4   :  { %s1456_s5 = scalar_lea.hbm %s2670_s3, 128 }
 0x1c5   :  { %p1457_p13 = scmp.ne.s32.totalorder %s2670_s3, %s1456_s5  ;;  %p1460_p0 = scmp.lt.u32.totalorder %s1456_s5, %s2670_s3 }
 0x1c7   :  { %p1462_p1 = pnand %p1460_p0, %p1457_p13 }
 0x1c9   :  { %1465 = shalt.err (!%p1462_p1)
}
 0x1ca   :  { %1398 = dma.vmem_to_hbm [thread:$0]  %s1396_s1, 128, %s2670_s3, [#allocation4]  }
 0x1cb   :  { %1468 = dma.done.wait [#allocation4], 128  }
 0x1cc   :  { %1469 = vsyncadd [#allocation4], 4294967168 }
 0x1cd   :  { %1402 = vsyncpa [#allocation3], 1 }
 0x1ce   :  { %1403 = vsyncpa [#allocation4], 1 }

</bundles_post_ra>
